<compile_context>
chip_gen: v7x
topology: tpu7x:2x2x1
jax: 0.10.0
libtpu: 0.0.40
codegen_flags: <defaults>
</compile_context>

<pallas_src>
import jax
import jax.numpy as jnp
from jax.experimental import pallas as pl
from jax.experimental.pallas import tpu as pltpu


def _round_up(n, m):
    return (n + m - 1) // m * m


def ensemble_kernel(x_ref, w_ref, bmean_ref, o_ref):
    # Single MXU pass: [tB, D] bf16 @ [D, KP] bf16 -> f32, bias added once.
    o_ref[...] = (
        jnp.dot(x_ref[...], w_ref[...], preferred_element_type=jnp.float32)
        + bmean_ref[...]
    )


def pack_ensemble_params(w_stack, b_stack):
    """One-time packing at parameter-load time.

    w_stack: [M, D, K] f32, b_stack: [M, K] f32
    Returns (w_packed [D, KP] bf16, b_mean [1, KP] f32, K).
    """
    M, D, K = w_stack.shape
    KP = _round_up(K, 128)  # lane-dense output columns / full MXU N-dim

    # mean over models in f32, then a single bf16 cast (better accuracy than
    # casting each head separately).
    w_mean = jnp.mean(w_stack.astype(jnp.float32), axis=0)          # [D, K]
    w_packed = jnp.zeros((D, KP), jnp.bfloat16).at[:, :K].set(
        w_mean.astype(jnp.bfloat16))

    b_mean = jnp.zeros((1, KP), jnp.float32).at[0, :K].set(
        jnp.mean(b_stack.astype(jnp.float32), axis=0))
    return w_packed, b_mean, K


def ensemble_forward(x_nchw, w_packed, b_mean, num_classes, *, tile_b=256):
    """x_nchw: [B, C, H, W]; w_packed: [D, KP] bf16; b_mean: [1, KP] f32 -> [B, K]."""
    B = x_nchw.shape[0]
    D, KP = w_packed.shape

    # bf16 rows pack 16 per sublane group -> pad/tile batch in multiples of 16.
    BP = _round_up(max(B, 16), 16)
    tB = min(tile_b, BP)
    BP = _round_up(BP, tB)

    x_flat = x_nchw.reshape(B, -1).astype(jnp.bfloat16)
    x_pad = jnp.zeros((BP, D), jnp.bfloat16).at[:B].set(x_flat)

    out = pl.pallas_call(
        ensemble_kernel,
        out_shape=jax.ShapeDtypeStruct((BP, KP), jnp.float32),
        grid_spec=pltpu.PrefetchScalarGridSpec(
            num_scalar_prefetch=0,
            grid=(BP // tB,),                                   # batch tiles
            in_specs=[
                pl.BlockSpec((tB, D), lambda i: (i, 0)),        # activations
                # Grid-invariant blocks -> single buffer (halves their VMEM).
                pl.BlockSpec((D, KP), lambda i: (0, 0),
                             pipeline_mode=pl.Buffered(1)),     # mean weights
                pl.BlockSpec((1, KP), lambda i: (0, 0),
                             pipeline_mode=pl.Buffered(1)),     # mean bias
            ],
            out_specs=pl.BlockSpec((tB, KP), lambda i: (i, 0)),
        ),
        compiler_params=pltpu.CompilerParams(
            dimension_semantics=("parallel",),                  # shard batch on v7x
        ),
    )(x_pad, w_packed, b_mean)

    return out[:B, :num_classes]


def ensemble_reference(x_nchw, w_stack, b_stack):
    B = x_nchw.shape[0]
    M, D, K = w_stack.shape
    x_flat = x_nchw.reshape(B, D).astype(jnp.float32)
    outs = jnp.einsum(
        "bd,mdk->mbk", x_flat, w_stack.astype(jnp.float32)
    ) + b_stack.astype(jnp.float32)[:, None, :]
    return jnp.mean(outs, axis=0)


if __name__ == "__main__":
    key = jax.random.PRNGKey(0)
    B, C, H, W = 2, 4, 16, 16           # small CIFAR-like NCHW input
    M = 3                               # number of models in the ensemble
    D = C * H * W
    K = 10                              # class logits

    kx, kw, kb = jax.random.split(key, 3)
    x = jax.random.normal(kx, (B, C, H, W), dtype=jnp.float32)
    w_stack = jax.random.normal(kw, (M, D, K), dtype=jnp.float32) * 0.02
    b_stack = jax.random.normal(kb, (M, K), dtype=jnp.float32) * 0.1

    # One-time parameter packing (parameter-load time, not per forward call).
    w_packed, b_mean, num_classes = pack_ensemble_params(w_stack, b_stack)

    out = ensemble_forward(x, w_packed, b_mean, num_classes)
    out = jax.block_until_ready(out)

    ref = ensemble_reference(x, w_stack, b_stack)
    assert out.shape == (B, K)
    # bf16 streaming of x / mean-W with f32 accumulation -> relaxed tolerance.
    assert jnp.allclose(out, ref, atol=2e-2, rtol=2e-2), (out, ref)

    print("KERNEL_OK")
</pallas_src>

<mosaic_0001>
module attributes {stable_mosaic.version = 11 : i64} {
  func.func @ensemble_kernel(%arg0: i32, %arg1: memref<16x1024xbf16, #tpu.memory_space<vmem>>, %arg2: memref<1024x128xbf16, #tpu.memory_space<vmem>>, %arg3: memref<1x128xf32, #tpu.memory_space<vmem>>, %arg4: memref<16x128xf32, #tpu.memory_space<vmem>>) attributes {dimension_semantics = [#tpu.dimension_semantics<parallel>], iteration_bounds = array<i64: 1>, scalar_prefetch = 0 : i64, scratch_operands = 0 : i64, tpu.core_type = #tpu.core_type<tc>, window_params = [{transform_indices = @transform_0, window_bounds = array<i64: 16, 1024>}, {pipeline_mode = #tpu.pipeline_mode<synchronous>, transform_indices = @transform_1, window_bounds = array<i64: 1024, 128>}, {pipeline_mode = #tpu.pipeline_mode<synchronous>, transform_indices = @transform_2, window_bounds = array<i64: 1, 128>}, {transform_indices = @transform_3, window_bounds = array<i64: 16, 128>}]} {
    %c0 = arith.constant 0 : index
    %c0_0 = arith.constant 0 : index
    %0 = vector.load %arg1[%c0, %c0_0] : memref<16x1024xbf16, #tpu.memory_space<vmem>>, vector<16x1024xbf16>
    %c0_1 = arith.constant 0 : index
    %c0_2 = arith.constant 0 : index
    %1 = vector.load %arg2[%c0_1, %c0_2] : memref<1024x128xbf16, #tpu.memory_space<vmem>>, vector<1024x128xbf16>
    %cst = arith.constant dense<0.000000e+00> : vector<16x128xf32>
    %2 = tpu.matmul %0, %1, %cst {dimension_numbers = #tpu.dot_dimension_numbers<[1], [0], [0], [1], [0, 0, 1, 1], [], []>} : vector<16x1024xbf16>, vector<1024x128xbf16>, vector<16x128xf32> -> vector<16x128xf32>
    %c0_3 = arith.constant 0 : index
    %c0_4 = arith.constant 0 : index
    %3 = vector.load %arg3[%c0_3, %c0_4] : memref<1x128xf32, #tpu.memory_space<vmem>>, vector<1x128xf32>
    %4 = vector.broadcast %3 : vector<1x128xf32> to vector<16x128xf32>
    %5 = arith.addf %2, %4 : vector<16x128xf32>
    %c0_5 = arith.constant 0 : index
    %c0_6 = arith.constant 0 : index
    %6 = vector.load %arg4[%c0_5, %c0_6] : memref<16x128xf32, #tpu.memory_space<vmem>>, vector<16x128xf32>
    tpu.vector_store %arg4[%c0_5, %c0_6], %5 {strides = array<i32>} : memref<16x128xf32, #tpu.memory_space<vmem>>, vector<16x128xf32>,
    return
  }
  func.func @transform_0(%arg0: i32) -> (i32, i32) {
    %c0_i32 = arith.constant 0 : i32
    %c0_i32_0 = arith.constant 0 : i32
    return %arg0, %c0_i32 : i32, i32
  }
  func.func @transform_1(%arg0: i32) -> (i32, i32) {
    %c0_i32 = arith.constant 0 : i32
    %c0_i32_0 = arith.constant 0 : i32
    %c0_i32_1 = arith.constant 0 : i32
    return %c0_i32, %c0_i32_0 : i32, i32
  }
  func.func @transform_2(%arg0: i32) -> (i32, i32) {
    %c0_i32 = arith.constant 0 : i32
    %c0_i32_0 = arith.constant 0 : i32
    %c0_i32_1 = arith.constant 0 : i32
    return %c0_i32, %c0_i32_0 : i32, i32
  }
  func.func @transform_3(%arg0: i32) -> (i32, i32) {
    %c0_i32 = arith.constant 0 : i32
    %c0_i32_0 = arith.constant 0 : i32
    return %arg0, %c0_i32 : i32, i32
  }
}

</mosaic_0001>

<bundles_post_ra>
// kernel: tpu_custom_call.1
= control target key start
LH: loop header
LB: loop body
LE: loop exit
PB: predicated region body
PF: predicated region fallthrough
CT: control target
= control target key end

     0   :  { %8 = vsyncpa [#allocation3], 0  ;;  %s1169_s0 = inlined_call_operand.hbm [shape: bf16[16,1024], index: 0, kind: input, shape index: {}]   ;;  %s1170_s1 = inlined_call_operand.hbm [shape: bf16[1024,128], index: 1, kind: input, shape index: {}]   ;;  %s1171_s2 = inlined_call_operand.vmem [shape: f32[1,128], index: 2, kind: input, shape index: {}]   ;;  %s1172_s3 = inlined_call_operand.hbm [shape: f32[16,128], index: 3, kind: output, shape index: {}]  }
   0x1   :  { %9 = vsyncpa [#allocation6], 0 }
   0x2   :  { %10 = vsyncpa [#allocation4], 0  ;;  %s1101_s12 = smov [#allocation2]   ;;  %s1029_s16 = scalar_lea.hbm %s1169_s0, 1024 }
   0x3   :  { %s16_s13 = sshll.u32 %s1101_s12, 4  ;;  %p1030_p0 = scmp.ne.s32.totalorder %s1169_s0, %s1029_s16  ;;  %s17_s13 = int_to_ptr.vmem [resolvable:$true] %s16_s13 }
   0x4   :  { %p1033_p1 = scmp.lt.u32.totalorder %s1029_s16, %s1169_s0 }
   0x6   :  { %p1035_p2 = pnand %p1033_p1, %p1030_p0 }
   0x8   :  { %1038 = shalt.err (!%p1035_p2)
}
   0x9   :  { %s1039_s21 = scalar_lea.vmem %s17_s13, 1024  ;;  %p1044_p4 = scmp.lt.s32.totalorder %s17_s13, %s17_s13 }
   0xa   :  { %p1040_p3 = scmp.ne.s32.totalorder %s17_s13, %s1039_s21  ;;  %p1045_p5 = scmp.lt.s32.totalorder %s1039_s21, %s1039_s21 }
   0xc   :  { %p1046_p6 = por %p1045_p5, %p1044_p4 }
   0xe   :  { %p1047_p7 = pnand %p1046_p6, %p1040_p3 }
  0x10   :  { %1050 = shalt.err (!%p1047_p7)
}
  0x11   :  { %s1102_s22 = smov 512   ;;  %s1103_s23 = smov 32  }
  0x12   :  { %22 = dma.hbm_to_vmem [thread:$0]  %s1169_s0, 1024, %s17_s13, [#allocation3], %s1102_s22, %s1102_s22, %s1103_s23  }
  0x13   :  { %s1104_s26 = smov [#allocation5]   ;;  %s1051_s30 = scalar_lea.hbm %s1170_s1, 8192 }
  0x14   :  { %s28_s27 = sshll.u32 %s1104_s26, 4  ;;  %p1052_p8 = scmp.ne.s32.totalorder %s1170_s1, %s1051_s30  ;;  %s29_s27 = int_to_ptr.vmem [resolvable:$true] %s28_s27 }
  0x15   :  { %p1055_p9 = scmp.lt.u32.totalorder %s1051_s30, %s1170_s1 }
  0x17   :  { %p1057_p10 = pnand %p1055_p9, %p1052_p8 }
  0x19   :  { %1060 = shalt.err (!%p1057_p10)
}
  0x1a   :  { %s1061_s8 = scalar_lea.vmem %s29_s27, 8192  ;;  %p1066_p12 = scmp.lt.s32.totalorder %s29_s27, %s29_s27 }
  0x1b   :  { %p1062_p11 = scmp.ne.s32.totalorder %s29_s27, %s1061_s8  ;;  %p1067_p13 = scmp.lt.s32.totalorder %s1061_s8, %s1061_s8 }
  0x1d   :  { %p1068_p0 = por %p1067_p13, %p1066_p12 }
  0x1f   :  { %p1069_p1 = pnand %p1068_p0, %p1062_p11 }
  0x21   :  { %1072 = shalt.err (!%p1069_p1)
}
  0x22   :  { %s1105_s0 = smov 64   ;;  %s1106_s9 = smov 4  }
  0x23   :  { %34 = dma.hbm_to_vmem [thread:$0]  %s1170_s1, 8192, %s29_s27, [#allocation6], %s1105_s0, %s1105_s0, %s1106_s9  }
  0x24   :  { %1095 = dma.done.wait [#allocation3], 1024  }
  0x25   :  { %1096 = vsyncadd [#allocation3], 4294966272 }
  0x26   :  { %1097 = dma.done.wait [#allocation6], 8192  }
  0x27   :  { %1098 = vsyncadd [#allocation6], 4294959104  ;;  %v965_v0 = vld [vmem:[#allocation5 + $0x40] sm:$0xff]   ;;  %v969_v4 = vld [vmem:[#allocation5 + $0x48] sm:$0xff]  }
  0x28   :  { %v966_v1 = vld [vmem:[#allocation5 + $0xc0] sm:$0xff]   ;;  %868 = vmatprep.subr.bf16.mxu0 %v965_v0  ;;  %v970_v5 = vld [vmem:[#allocation5 + $0xc8] sm:$0xff]   ;;  %v973_v8 = vld [vmem:[#allocation5 + $0x50] sm:$0xff]  }
  0x29   :  { %v967_v2 = vld [vmem:[#allocation5] sm:$0xff]   ;;  %890 = vmatprep.subr.bf16.mxu1 %v966_v1  ;;  %v971_v6 = vld [vmem:[#allocation5 + $0x8] sm:$0xff]   ;;  %v974_v9 = vld [vmem:[#allocation5 + $0xd0] sm:$0xff]  }
  0x2a   :  { %v968_v3 = vld [vmem:[#allocation5 + $0x80] sm:$0xff]   ;;  %869 = vmatpush3.bf16.msra.mxu0 %v967_v2  ;;  %v972_v7 = vld [vmem:[#allocation5 + $0x88] sm:$0xff]   ;;  %v975_v10 = vld [vmem:[#allocation5 + $0x10] sm:$0xff]  }
  0x2b   :  { %891 = vmatpush3.bf16.msra.mxu1 %v968_v3  ;;  %870 = vmatprep.subr.bf16.mxu0 %v969_v4  ;;  %v976_v11 = vld [vmem:[#allocation5 + $0x90] sm:$0xff]   ;;  %v977_v12 = vld [vmem:[#allocation5 + $0x58] sm:$0xff]   ;;  %v981_v16 = vld [vmem:[#allocation5 + $0x60] sm:$0xff]  }
  0x2c   :  { %892 = vmatprep.subr.bf16.mxu1 %v970_v5  ;;  %v978_v13 = vld [vmem:[#allocation5 + $0xd8] sm:$0xff]   ;;  %v982_v17 = vld [vmem:[#allocation5 + $0xe0] sm:$0xff]   ;;  %v985_v20 = vld [vmem:[#allocation5 + $0x68] sm:$0xff]  }
  0x2d   :  { %v979_v14 = vld [vmem:[#allocation5 + $0x18] sm:$0xff]   ;;  %v983_v18 = vld [vmem:[#allocation5 + $0x20] sm:$0xff]   ;;  %v986_v21 = vld [vmem:[#allocation5 + $0xe8] sm:$0xff]  }
  0x2e   :  { %871 = vmatpush3.bf16.msra.mxu0 %v971_v6  ;;  %v980_v15 = vld [vmem:[#allocation5 + $0x98] sm:$0xff]   ;;  %v984_v19 = vld [vmem:[#allocation5 + $0xa0] sm:$0xff]   ;;  %v987_v22 = vld [vmem:[#allocation5 + $0x28] sm:$0xff]  }
  0x2f   :  { %893 = vmatpush3.bf16.msra.mxu1 %v972_v7  ;;  %872 = vmatprep.subr.bf16.mxu0 %v973_v8  ;;  %v988_v23 = vld [vmem:[#allocation5 + $0xa8] sm:$0xff]   ;;  %v989_v24 = vld [vmem:[#allocation5 + $0x70] sm:$0xff]   ;;  %v993_v28 = vld [vmem:[#allocation5 + $0x78] sm:$0xff]  }
  0x30   :  { %894 = vmatprep.subr.bf16.mxu1 %v974_v9  ;;  %v990_v25 = vld [vmem:[#allocation5 + $0xf0] sm:$0xff]   ;;  %v994_v29 = vld [vmem:[#allocation5 + $0xf8] sm:$0xff]   ;;  %v44_v32 = vld [vmem:[#allocation2] sm:$0xff] }
  0x31   :  { %v991_v26 = vld [vmem:[#allocation5 + $0x30] sm:$0xff]   ;;  %v995_v30 = vld [vmem:[#allocation5 + $0x38] sm:$0xff]   ;;  %v48_v33 = vld [vmem:[#allocation2 + $0x20] sm:$0xff] }
  0x32   :  { %873 = vmatpush3.bf16.msra.mxu0 %v975_v10  ;;  %v992_v27 = vld [vmem:[#allocation5 + $0xb0] sm:$0xff]   ;;  %v996_v31 = vld [vmem:[#allocation5 + $0xb8] sm:$0xff]   ;;  %v45_v34 = vld [vmem:[#allocation2 + $0x8] sm:$0xff]  ;;  %v796_v35 = vcombine.low %v44_v32, %v48_v33  ;;  %v797_v36 = vcombine.high %v44_v32, %v48_v33 }
  0x33   :  { %895 = vmatpush3.bf16.msra.mxu1 %v976_v11  ;;  %874 = vmatprep.subr.bf16.mxu0 %v977_v12  ;;  %v49_v37 = vld [vmem:[#allocation2 + $0x28] sm:$0xff]  ;;  %v997_v40 = vld [vmem:[#allocation5 + $0x140] sm:$0xff]   ;;  %v1005_v48 = vld [vmem:[#allocation5 + $0x150] sm:$0xff]  }
  0x34   :  { %896 = vmatprep.subr.bf16.mxu1 %v978_v13  ;;  %v798_v38 = vcombine.low %v45_v34, %v49_v37  ;;  %v799_v39 = vcombine.high %v45_v34, %v49_v37  ;;  %643 = vmatprep.mubr.bf16.mxu0 %v797_v36  ;;  %v998_v41 = vld [vmem:[#allocation5 + $0x1c0] sm:$0xff]   ;;  %v1001_v44 = vld [vmem:[#allocation5 + $0x148] sm:$0xff]   ;;  %v1006_v49 = vld [vmem:[#allocation5 + $0x1d0] sm:$0xff]  }
  0x35   :  { %v999_v42 = vld [vmem:[#allocation5 + $0x100] sm:$0xff]   ;;  %v1002_v45 = vld [vmem:[#allocation5 + $0x1c8] sm:$0xff]   ;;  %v1007_v50 = vld [vmem:[#allocation5 + $0x110] sm:$0xff]  }
  0x36   :  { %875 = vmatpush3.bf16.msra.mxu0 %v979_v14  ;;  %684 = vmatprep.mubr.bf16.mxu1 %v799_v39  ;;  %v1000_v43 = vld [vmem:[#allocation5 + $0x180] sm:$0xff]   ;;  %v1003_v46 = vld [vmem:[#allocation5 + $0x108] sm:$0xff]   ;;  %v1008_v51 = vld [vmem:[#allocation5 + $0x190] sm:$0xff]  }
  0x37   :  { %897 = vmatpush3.bf16.msra.mxu1 %v980_v15  ;;  %876 = vmatprep.subr.bf16.mxu0 %v981_v16  ;;  %v1004_v47 = vld [vmem:[#allocation5 + $0x188] sm:$0xff]   ;;  %v1009_v52 = vld [vmem:[#allocation5 + $0x158] sm:$0xff]   ;;  %v1013_v56 = vld [vmem:[#allocation5 + $0x160] sm:$0xff]  }
  0x38   :  { %898 = vmatprep.subr.bf16.mxu1 %v982_v17  ;;  %v1010_v53 = vld [vmem:[#allocation5 + $0x1d8] sm:$0xff]   ;;  %v1014_v57 = vld [vmem:[#allocation5 + $0x1e0] sm:$0xff]   ;;  %v1017_v60 = vld [vmem:[#allocation5 + $0x168] sm:$0xff]  }
  0x39   :  { %v1011_v54 = vld [vmem:[#allocation5 + $0x118] sm:$0xff]   ;;  %v1015_v58 = vld [vmem:[#allocation5 + $0x120] sm:$0xff]   ;;  %v1018_v61 = vld [vmem:[#allocation5 + $0x1e8] sm:$0xff]  }
  0x3a   :  { %877 = vmatpush3.bf16.msra.mxu0 %v983_v18  ;;  %v1012_v55 = vld [vmem:[#allocation5 + $0x198] sm:$0xff]   ;;  %v1016_v59 = vld [vmem:[#allocation5 + $0x1a0] sm:$0xff]   ;;  %v1019_v62 = vld [vmem:[#allocation5 + $0x128] sm:$0xff]  }
  0x3b   :  { %899 = vmatpush3.bf16.msra.mxu1 %v984_v19  ;;  %878 = vmatprep.subr.bf16.mxu0 %v985_v20  ;;  %v1020_v63 = vld [vmem:[#allocation5 + $0x1a8] sm:$0xff]   ;;  %v1021_v0 = vld [vmem:[#allocation5 + $0x170] sm:$0xff]   ;;  %v1025_v4 = vld [vmem:[#allocation5 + $0x178] sm:$0xff]  }
  0x3c   :  { %900 = vmatprep.subr.bf16.mxu1 %v986_v21  ;;  %v1022_v1 = vld [vmem:[#allocation5 + $0x1f0] sm:$0xff]   ;;  %v1026_v5 = vld [vmem:[#allocation5 + $0x1f8] sm:$0xff]   ;;  %v795_v18 = vld [vmem:[%s1171_s2] ss:$0 sm:$0xff]  ;;  %s1107_s2 = smov [#allocation7]  }
  0x3d   :  { %v1023_v2 = vld [vmem:[#allocation5 + $0x130] sm:$0xff]   ;;  %v1027_v6 = vld [vmem:[#allocation5 + $0x138] sm:$0xff]   ;;  %s782_s13 = sshll.u32 %s1107_s2, 4  ;;  %s783_s13 = int_to_ptr.vmem [resolvable:$true] %s782_s13 }
  0x3e   :  { %879 = vmatpush3.bf16.msra.mxu0 %v987_v22  ;;  %v1024_v3 = vld [vmem:[#allocation5 + $0x1b0] sm:$0xff]   ;;  %v1028_v7 = vld [vmem:[#allocation5 + $0x1b8] sm:$0xff]   ;;  %s1073_s14 = scalar_lea.vmem %s783_s13, 256  ;;  %p1078_p3 = scmp.lt.s32.totalorder %s783_s13, %s783_s13 }
  0x3f   :  { %901 = vmatpush3.bf16.msra.mxu1 %v988_v23  ;;  %880 = vmatprep.subr.bf16.mxu0 %v989_v24  ;;  %v46_v8 = vld [vmem:[#allocation2 + $0x10] sm:$0xff]  ;;  %v47_v12 = vld [vmem:[#allocation2 + $0x18] sm:$0xff]  ;;  %p1074_p2 = scmp.ne.s32.totalorder %s783_s13, %s1073_s14  ;;  %p1079_p4 = scmp.lt.s32.totalorder %s1073_s14, %s1073_s14 }
  0x40   :  { %902 = vmatprep.subr.bf16.mxu1 %v990_v25  ;;  %v50_v9 = vld [vmem:[#allocation2 + $0x30] sm:$0xff]  ;;  %v51_v13 = vld [vmem:[#allocation2 + $0x38] sm:$0xff] }
  0x41   :  { %v800_v10 = vcombine.low %v46_v8, %v50_v9  ;;  %v801_v11 = vcombine.high %v46_v8, %v50_v9  ;;  %v802_v14 = vcombine.low %v47_v12, %v51_v13  ;;  %v803_v15 = vcombine.high %v47_v12, %v51_v13  ;;  %p1080_p5 = por %p1079_p4, %p1078_p3 }
  0x42   :  { %881 = vmatpush3.bf16.msra.mxu0 %v991_v26 }
  0x43   :  { %903 = vmatpush3.bf16.msra.mxu1 %v992_v27  ;;  %882 = vmatprep.subr.bf16.mxu0 %v993_v28  ;;  %p1081_p6 = pnand %p1080_p5, %p1074_p2 }
  0x44   :  { %904 = vmatprep.subr.bf16.mxu1 %v994_v29 }
  0x46   :  { %883 = vmatpush3.bf16.msra.mxu0 %v995_v30 }
  0x47   :  { %905 = vmatpush3.bf16.msra.mxu1 %v996_v31  ;;  %912 = vmatprep.subr.bf16.mxu0 %v997_v40 }
  0x48   :  { %934 = vmatprep.subr.bf16.mxu1 %v998_v41 }
  0x49   :  { %644 = vmatmul.mubr.bf16.vlgmr.msra.gmra.mrb[0].mxu0 %v796_v35 }
  0x4a   :  { %685 = vmatmul.mubr.bf16.vlgmr.msra.gmra.mrb[0].mxu1 %v798_v38  ;;  %913 = vmatpush3.bf16.msra.mxu0 %v999_v42 }
  0x4b   :  { %935 = vmatpush3.bf16.msra.mxu1 %v1000_v43  ;;  %914 = vmatprep.subr.bf16.mxu0 %v1001_v44 }
  0x4c   :  { %936 = vmatprep.subr.bf16.mxu1 %v1002_v45  ;;  %725 = vmatprep.mubr.bf16.mxu0 %v801_v11 }
  0x4d   :  { %766 = vmatprep.mubr.bf16.mxu1 %v803_v15 }
  0x4e   :  { %915 = vmatpush3.bf16.msra.mxu0 %v1003_v46 }
  0x4f   :  { %937 = vmatpush3.bf16.msra.mxu1 %v1004_v47  ;;  %916 = vmatprep.subr.bf16.mxu0 %v1005_v48 }
  0x50   :  { %938 = vmatprep.subr.bf16.mxu1 %v1006_v49 }
  0x52   :  { %917 = vmatpush3.bf16.msra.mxu0 %v1007_v50 }
  0x53   :  { %939 = vmatpush3.bf16.msra.mxu1 %v1008_v51  ;;  %918 = vmatprep.subr.bf16.mxu0 %v1009_v52 }
  0x54   :  { %940 = vmatprep.subr.bf16.mxu1 %v1010_v53 }
  0x56   :  { %919 = vmatpush3.bf16.msra.mxu0 %v1011_v54 }
  0x57   :  { %941 = vmatpush3.bf16.msra.mxu1 %v1012_v55  ;;  %920 = vmatprep.subr.bf16.mxu0 %v1013_v56 }
  0x58   :  { %942 = vmatprep.subr.bf16.mxu1 %v1014_v57 }
  0x5a   :  { %921 = vmatpush3.bf16.msra.mxu0 %v1015_v58 }
  0x5b   :  { %943 = vmatpush3.bf16.msra.mxu1 %v1016_v59  ;;  %922 = vmatprep.subr.bf16.mxu0 %v1017_v60 }
  0x5c   :  { %944 = vmatprep.subr.bf16.mxu1 %v1018_v61 }
  0x5e   :  { %923 = vmatpush3.bf16.msra.mxu0 %v1019_v62 }
  0x5f   :  { %945 = vmatpush3.bf16.msra.mxu1 %v1020_v63  ;;  %924 = vmatprep.subr.bf16.mxu0 %v1021_v0 }
  0x60   :  { %946 = vmatprep.subr.bf16.mxu1 %v1022_v1 }
  0x62   :  { %925 = vmatpush3.bf16.msra.mxu0 %v1023_v2 }
  0x63   :  { %947 = vmatpush3.bf16.msra.mxu1 %v1024_v3  ;;  %926 = vmatprep.subr.bf16.mxu0 %v1025_v4 }
  0x64   :  { %948 = vmatprep.subr.bf16.mxu1 %v1026_v5 }
  0x66   :  { %927 = vmatpush3.bf16.msra.mxu0 %v1027_v6 }
  0x67   :  { %949 = vmatpush3.bf16.msra.mxu1 %v1028_v7 }
  0x69   :  { %726 = vmatmul.mubr.bf16.vlgmr.msra.gmra.mrb[4].mxu0 %v800_v10 }
  0x6a   :  { %767 = vmatmul.mubr.bf16.vlgmr.msra.gmra.mrb[4].mxu1 %v802_v14 }
 0x11c   :  { %v884_v16 = vpop.f32.mrb[0].mxu0 }
 0x11d   :  { %v906_v17 = vpop.f32.mrb[0].mxu1  ;;  %v885_v19 = vpop.f32.mrb[1].mxu0 }
 0x11e   :  { %v886_v20 = vadd.f32 %v885_v19, %v884_v16  ;;  %v907_v21 = vpop.f32.mrb[1].mxu1  ;;  %v887_v22 = vpop.f32.mrb[2].mxu0 }
 0x11f   :  { %v908_v23 = vadd.f32 %v907_v21, %v906_v17  ;;  %v909_v24 = vpop.f32.mrb[2].mxu1  ;;  %v888_v25 = vpop.f32.mrb[3].mxu0 }
 0x120   :  { %v646_v26 = vadd.f32 %v886_v20, %v795_v18  ;;  %v889_v27 = vadd.f32 %v888_v25, %v887_v22  ;;  %v910_v28 = vpop.f32.mrb[3].mxu1 }
 0x121   :  { %v911_v29 = vadd.f32 %v910_v28, %v909_v24 }
 0x122   :  { %v687_v30 = vadd.f32 %v908_v23, %v646_v26  ;;  %v649_v31 = vadd.f32 %v889_v27, %v795_v18 }
 0x124   :  { %v690_v32 = vadd.f32 %v911_v29, %v649_v31 }
 0x13c   :  { %v928_v33 = vpop.f32.mrb[4].mxu0 }
 0x13d   :  { %v950_v34 = vpop.f32.mrb[4].mxu1  ;;  %v929_v35 = vpop.f32.mrb[5].mxu0 }
 0x13e   :  { %v930_v36 = vadd.f32 %v929_v35, %v928_v33  ;;  %v951_v37 = vpop.f32.mrb[5].mxu1  ;;  %v931_v38 = vpop.f32.mrb[6].mxu0 }
 0x13f   :  { %v952_v39 = vadd.f32 %v951_v37, %v950_v34  ;;  %v953_v40 = vpop.f32.mrb[6].mxu1  ;;  %v932_v41 = vpop.f32.mrb[7].mxu0 }
 0x140   :  { %v728_v42 = vadd.f32 %v930_v36, %v687_v30  ;;  %v933_v43 = vadd.f32 %v932_v41, %v931_v38  ;;  %v954_v44 = vpop.f32.mrb[7].mxu1 }
 0x141   :  { %v955_v45 = vadd.f32 %v954_v44, %v953_v40 }
 0x142   :  { %v769_v46 = vadd.f32 %v952_v39, %v728_v42  ;;  %v731_v47 = vadd.f32 %v933_v43, %v690_v32 }
 0x144   :  { %775 = vst [vmem:[#allocation7] sm:$0xff] %v769_v46  ;;  %v772_v48 = vadd.f32 %v955_v45, %v731_v47 }
 0x146   :  { %776 = vst [vmem:[#allocation7 + $0x8] sm:$0xff] %v772_v48 }
 0x147   :  { %1084 = shalt.err (!%p1081_p6)
}
 0x148   :  { %s1085_s17 = scalar_lea.hbm %s1172_s3, 256 }
 0x149   :  { %p1086_p7 = scmp.ne.s32.totalorder %s1172_s3, %s1085_s17  ;;  %p1089_p8 = scmp.lt.u32.totalorder %s1085_s17, %s1172_s3 }
 0x14b   :  { %p1091_p9 = pnand %p1089_p8, %p1086_p7 }
 0x14d   :  { %1094 = shalt.err (!%p1091_p9)
}
 0x14e   :  { %s1108_s22 = smov 128   ;;  %s1109_s23 = smov 8  }
 0x14f   :  { %788 = dma.vmem_to_hbm [thread:$0]  %s783_s13, 256, %s1172_s3, [#allocation4], %s1108_s22, %s1108_s22, %s1109_s23  }
 0x150   :  { %1099 = dma.done.wait [#allocation4], 256  }
 0x151   :  { %1100 = vsyncadd [#allocation4], 4294967040 }
 0x152   :  { %792 = vsyncpa [#allocation3], 1 }
 0x153   :  { %793 = vsyncpa [#allocation6], 1 }
 0x154   :  { %794 = vsyncpa [#allocation4], 1 }

</bundles_post_ra>
